<compile_context>
chip_gen: v5e
topology: v5e:2x2
jax: 0.10.0
libtpu: 0.0.40
codegen_flags: <defaults>
</compile_context>

<pallas_src>
import functools

import jax
import jax.numpy as jnp
import numpy as np
from jax.experimental import pallas as pl
from jax.experimental.pallas import tpu as pltpu


def _make_sample_kernel(*, num_steps, dsig, ortho, C, HW):
    """Builds the per-batch-element fused sampling kernel (grid=(B,))."""
    inv_n = 1.0 / float(C * HW)

    def kernel(x_ref, w_ref, add_ref, gcond_ref, o_ref):
        # x_ref    : f32[C, HW]   initial noise x_T for this batch element
        # w_ref    : f32[C, C]    1x1-conv (channel-mix) weight of the synthetic denoiser
        # add_ref  : f32[S, C, 1] per-step folded additive term: bias + sigma_s*temb + cond_b
        # gcond_ref: f32[C, 1]    (guidance_scale - 1) * cond_b
        # o_ref    : f32[C, HW]   final sample; written exactly once
        x = x_ref[...]
        w = w_ref[...]
        gcond_col = gcond_ref[...]
        # Hoist the loop-invariant lane broadcast (JAX does not CSE broadcast_in_dim).
        gcond_hw = jnp.broadcast_to(gcond_col, (C, HW))

        # num_steps is static -> this fully unrolls at trace time, and the per-step sigma
        # deltas dsig[s] fold in as immediates (no SMEM scalar loads, no dynamic indexing).
        for s in range(num_steps):
            # --- synthetic denoiser, positive (conditioned) CFG branch, on the VPU -----
            # u_pos = W @ x + bias + sigma_s*temb + cond, as C broadcast-FMAs: at C=8 an
            # MXU matmul would mostly pay push/result-FIFO latency.
            u_pos = w[:, 0:1] * x[0:1, :]
            for k in range(1, C):
                u_pos = u_pos + w[:, k:k + 1] * x[k:k + 1, :]
            u_pos = u_pos + add_ref[s]                               # (C,1) broadcast add

            # --- guidance_jit, using u_pos - u_neg == cond (exact for this synthetic
            #     denoiser; does NOT generalize to a real two-pass CFG denoiser) ---------
            #   bias_g = (g-1)*cond
            #   if ortho: bias_g -= mean(bias_g*u_pos)/clamp(mean(u_pos^2),1e-6) * u_pos
            #   u = u_pos + bias_g
            if ortho:
                row_sum = jnp.sum(u_pos, axis=1, keepdims=True)                      # (C,1)
                num = jnp.sum(gcond_col * row_sum, axis=0, keepdims=True) * inv_n    # (1,1)
                sq = jnp.sum(u_pos * u_pos, axis=1, keepdims=True)                   # (C,1)
                den = jnp.maximum(jnp.sum(sq, axis=0, keepdims=True) * inv_n, 1e-6)  # (1,1)
                r = pl.reciprocal(den, approx=True)      # EUP slot, off the VPU path
                r = r * (2.0 - den * r)                  # one Newton step -> f32 accuracy
                scale = 1.0 - num * r                    # (1,1)
                u = u_pos * scale + gcond_hw
            else:
                u = u_pos + gcond_hw

            # --- FlowMatchEulerDiscrete Euler step: x <- x + (sigma_next - sigma) * u ---
            x = x + dsig[s] * u

        o_ref[...] = x

    return kernel


@functools.partial(
    jax.jit,
    static_argnames=("num_timesteps", "num_inference_steps", "guidance_scale",
                     "shift", "orthogonal_guidance"))
def gaussian_flow_forward_test(noise, weight, bias, temb_w, cond, *,
                               num_timesteps=1000, num_inference_steps=4,
                               guidance_scale=3.0, shift=1.0,
                               orthogonal_guidance=True):
    """Pallas implementation of GaussianFlow.forward_test (output_mode='mean')."""
    del num_timesteps  # t / num_timesteps == sigmas[i]; kept for interface parity
    B, C, H, W = noise.shape
    HW = H * W
    S = int(num_inference_steps)

    # --- compile-time FlowMatchEulerDiscrete sigma schedule (shift=1 -> linear 1 -> 0) ---
    s_lin = np.linspace(1.0, 0.0, S + 1, dtype=np.float64)
    sigmas = (shift * s_lin / (1.0 + (shift - 1.0) * s_lin)).astype(np.float32)
    dsig = tuple(float(sigmas[i + 1] - sigmas[i]) for i in range(S))
    gm1 = float(guidance_scale) - 1.0

    # --- host-side folding of all per-step / per-batch additive constants ----------------
    x0 = noise.reshape(B, C, HW).astype(jnp.float32)
    w = weight.astype(jnp.float32)
    sig_c = jnp.asarray(sigmas[:S])                                        # (S,) trace const
    add = (bias.astype(jnp.float32)[None, None, :]
           + sig_c[None, :, None] * temb_w.astype(jnp.float32)[None, None, :]
           + cond.astype(jnp.float32)[:, None, :])                         # (B, S, C)
    add = add.reshape(B, S, C, 1)
    gcond = (gm1 * cond.astype(jnp.float32)).reshape(B, C, 1)

    kernel = _make_sample_kernel(num_steps=S, dsig=dsig,
                                 ortho=bool(orthogonal_guidance), C=C, HW=HW)

    out = pl.pallas_call(
        kernel,
        out_shape=jax.ShapeDtypeStruct((B, C, HW), jnp.float32),
        grid=(B,),
        in_specs=[
            pl.BlockSpec((pl.Squeezed(), C, HW), lambda b: (b, 0, 0)),        # noise x_T
            pl.BlockSpec((C, C), lambda b: (0, 0)),                            # conv weight
            pl.BlockSpec((pl.Squeezed(), S, C, 1), lambda b: (b, 0, 0, 0)),    # folded add tbl
            pl.BlockSpec((pl.Squeezed(), C, 1), lambda b: (b, 0, 0)),          # (g-1)*cond
        ],
        out_specs=pl.BlockSpec((pl.Squeezed(), C, HW), lambda b: (b, 0, 0)),
        compiler_params=pltpu.CompilerParams(dimension_semantics=("parallel",)),
    )(x0, w, add, gcond)
    return out.reshape(B, C, H, W)


def _reference(noise, weight, bias, temb_w, cond, *, num_timesteps, num_inference_steps,
               guidance_scale, shift, orthogonal_guidance):
    """Pure-JAX reference mirroring the PyTorch semantics."""
    del num_timesteps
    B, C, H, W = noise.shape
    x_t = noise.astype(jnp.float32)
    s = jnp.linspace(1.0, 0.0, num_inference_steps + 1)
    sigmas = shift * s / (1.0 + (shift - 1.0) * s)
    for i in range(num_inference_steps):
        t_frac = sigmas[i]
        x = x_t.reshape(B, C, H * W)
        u_base = jnp.einsum('oc,bcs->bos', weight, x) + bias[None, :, None] \
                 + temb_w[None, :, None] * t_frac
        u_neg = u_base.reshape(B, C, H, W)
        u_pos = (u_base + cond[:, :, None]).reshape(B, C, H, W)
        bias_g = (u_pos - u_neg) * (guidance_scale - 1.0)
        if orthogonal_guidance:
            num = jnp.mean(bias_g * u_pos, axis=(-3, -2, -1), keepdims=True)
            den = jnp.clip(jnp.mean(u_pos * u_pos, axis=(-3, -2, -1), keepdims=True), 1e-6)
            bias_g = bias_g - num / den * u_pos
        u = u_pos + bias_g
        x_t = x_t + (sigmas[i + 1] - sigmas[i]) * u
    return x_t


if __name__ == "__main__":
    B, C, H, W = 2, 8, 16, 16
    num_timesteps = 1000
    num_inference_steps = 4
    guidance_scale = 3.0

    key = jax.random.PRNGKey(0)
    k_noise, k_w, k_b, k_t, k_c = jax.random.split(key, 5)

    noise = jax.random.normal(k_noise, (B, C, H, W), dtype=jnp.float32)
    # Deterministic synthetic denoiser parameters (1x1 conv + time emb + conditioning).
    weight = 0.1 * jax.random.normal(k_w, (C, C), dtype=jnp.float32)
    bias = 0.05 * jax.random.normal(k_b, (C,), dtype=jnp.float32)
    temb_w = 0.05 * jax.random.normal(k_t, (C,), dtype=jnp.float32)
    cond = 0.1 * jax.random.normal(k_c, (B, C), dtype=jnp.float32)

    out = gaussian_flow_forward_test(
        noise, weight, bias, temb_w, cond,
        num_timesteps=num_timesteps,
        num_inference_steps=num_inference_steps,
        guidance_scale=guidance_scale,
        shift=1.0,
        orthogonal_guidance=True,
    )
    out = jax.block_until_ready(out)

    ref = _reference(
        noise, weight, bias, temb_w, cond,
        num_timesteps=num_timesteps,
        num_inference_steps=num_inference_steps,
        guidance_scale=guidance_scale,
        shift=1.0,
        orthogonal_guidance=True,
    )
    assert out.shape == (B, C, H, W)
    assert jnp.allclose(out, ref, atol=1e-4, rtol=1e-4)

    # TODO(synk): flow_loss / forward_train, timestep/noise samplers and the diffusers
    # scheduler zoo (sampler selection by name, output_mode='sample' GM path, pbar) have
    # no clean Pallas equivalent; only the sampling hot path (denoiser + guidance_jit +
    # FlowMatchEulerDiscrete Euler step) is implemented in-kernel.
    print("KERNEL_OK")
</pallas_src>

<mosaic_0001>
module attributes {stable_mosaic.version = 11 : i64} {
  func.func @kernel(%arg0: i32, %arg1: memref<1x8x256xf32, #tpu.memory_space<vmem>>, %arg2: memref<8x8xf32, #tpu.memory_space<vmem>>, %arg3: memref<1x4x8x1xf32, #tpu.memory_space<vmem>>, %arg4: memref<1x8x1xf32, #tpu.memory_space<vmem>>, %arg5: memref<1x8x256xf32, #tpu.memory_space<vmem>>) attributes {dimension_semantics = [#tpu.dimension_semantics<parallel>], iteration_bounds = array<i64: 2>, scalar_prefetch = 0 : i64, scratch_operands = 0 : i64, tpu.core_type = #tpu.core_type<tc>, window_params = [{transform_indices = @transform_0, window_bounds = array<i64: 1, 8, 256>}, {pipeline_mode = #tpu.pipeline_mode<synchronous>, transform_indices = @transform_1, window_bounds = array<i64: 8, 8>}, {transform_indices = @transform_2, window_bounds = array<i64: 1, 4, 8, 1>}, {transform_indices = @transform_3, window_bounds = array<i64: 1, 8, 1>}, {transform_indices = @transform_4, window_bounds = array<i64: 1, 8, 256>}]} {
    %c0 = arith.constant 0 : index
    %c0_0 = arith.constant 0 : index
    %c0_1 = arith.constant 0 : index
    %0 = vector.load %arg1[%c0, %c0_0, %c0_1] : memref<1x8x256xf32, #tpu.memory_space<vmem>>, vector<1x8x256xf32>
    %1 = vector.shape_cast %0 : vector<1x8x256xf32> to vector<8x256xf32>
    %c0_2 = arith.constant 0 : index
    %c0_3 = arith.constant 0 : index
    %2 = vector.load %arg2[%c0_2, %c0_3] : memref<8x8xf32, #tpu.memory_space<vmem>>, vector<8x8xf32>
    %c0_4 = arith.constant 0 : index
    %c0_5 = arith.constant 0 : index
    %c0_6 = arith.constant 0 : index
    %3 = vector.load %arg4[%c0_4, %c0_5, %c0_6] : memref<1x8x1xf32, #tpu.memory_space<vmem>>, vector<1x8x1xf32>
    %4 = vector.shape_cast %3 : vector<1x8x1xf32> to vector<8x1xf32>
    %5 = vector.shape_cast %4 : vector<8x1xf32> to vector<8x1xf32>
    %6 = vector.broadcast %5 : vector<8x1xf32> to vector<8x256xf32>
    %7 = vector.extract_strided_slice %2 {offsets = [0, 0], sizes = [8, 1], strides = [1, 1]} : vector<8x8xf32> to vector<8x1xf32>
    %8 = vector.extract_strided_slice %1 {offsets = [0, 0], sizes = [1, 256], strides = [1, 1]} : vector<8x256xf32> to vector<1x256xf32>
    %9 = vector.broadcast %7 : vector<8x1xf32> to vector<8x256xf32>
    %10 = vector.broadcast %8 : vector<1x256xf32> to vector<8x256xf32>
    %11 = arith.mulf %9, %10 : vector<8x256xf32>
    %12 = vector.extract_strided_slice %2 {offsets = [0, 1], sizes = [8, 1], strides = [1, 1]} : vector<8x8xf32> to vector<8x1xf32>
    %13 = vector.extract_strided_slice %1 {offsets = [1, 0], sizes = [1, 256], strides = [1, 1]} : vector<8x256xf32> to vector<1x256xf32>
    %14 = vector.broadcast %12 : vector<8x1xf32> to vector<8x256xf32>
    %15 = vector.broadcast %13 : vector<1x256xf32> to vector<8x256xf32>
    %16 = arith.mulf %14, %15 : vector<8x256xf32>
    %17 = arith.addf %11, %16 : vector<8x256xf32>
    %18 = vector.extract_strided_slice %2 {offsets = [0, 2], sizes = [8, 1], strides = [1, 1]} : vector<8x8xf32> to vector<8x1xf32>
    %19 = vector.extract_strided_slice %1 {offsets = [2, 0], sizes = [1, 256], strides = [1, 1]} : vector<8x256xf32> to vector<1x256xf32>
    %20 = vector.broadcast %18 : vector<8x1xf32> to vector<8x256xf32>
    %21 = vector.broadcast %19 : vector<1x256xf32> to vector<8x256xf32>
    %22 = arith.mulf %20, %21 : vector<8x256xf32>
    %23 = arith.addf %17, %22 : vector<8x256xf32>
    %24 = vector.extract_strided_slice %2 {offsets = [0, 3], sizes = [8, 1], strides = [1, 1]} : vector<8x8xf32> to vector<8x1xf32>
    %25 = vector.extract_strided_slice %1 {offsets = [3, 0], sizes = [1, 256], strides = [1, 1]} : vector<8x256xf32> to vector<1x256xf32>
    %26 = vector.broadcast %24 : vector<8x1xf32> to vector<8x256xf32>
    %27 = vector.broadcast %25 : vector<1x256xf32> to vector<8x256xf32>
    %28 = arith.mulf %26, %27 : vector<8x256xf32>
    %29 = arith.addf %23, %28 : vector<8x256xf32>
    %30 = vector.extract_strided_slice %2 {offsets = [0, 4], sizes = [8, 1], strides = [1, 1]} : vector<8x8xf32> to vector<8x1xf32>
    %31 = vector.extract_strided_slice %1 {offsets = [4, 0], sizes = [1, 256], strides = [1, 1]} : vector<8x256xf32> to vector<1x256xf32>
    %32 = vector.broadcast %30 : vector<8x1xf32> to vector<8x256xf32>
    %33 = vector.broadcast %31 : vector<1x256xf32> to vector<8x256xf32>
    %34 = arith.mulf %32, %33 : vector<8x256xf32>
    %35 = arith.addf %29, %34 : vector<8x256xf32>
    %36 = vector.extract_strided_slice %2 {offsets = [0, 5], sizes = [8, 1], strides = [1, 1]} : vector<8x8xf32> to vector<8x1xf32>
    %37 = vector.extract_strided_slice %1 {offsets = [5, 0], sizes = [1, 256], strides = [1, 1]} : vector<8x256xf32> to vector<1x256xf32>
    %38 = vector.broadcast %36 : vector<8x1xf32> to vector<8x256xf32>
    %39 = vector.broadcast %37 : vector<1x256xf32> to vector<8x256xf32>
    %40 = arith.mulf %38, %39 : vector<8x256xf32>
    %41 = arith.addf %35, %40 : vector<8x256xf32>
    %42 = vector.extract_strided_slice %2 {offsets = [0, 6], sizes = [8, 1], strides = [1, 1]} : vector<8x8xf32> to vector<8x1xf32>
    %43 = vector.extract_strided_slice %1 {offsets = [6, 0], sizes = [1, 256], strides = [1, 1]} : vector<8x256xf32> to vector<1x256xf32>
    %44 = vector.broadcast %42 : vector<8x1xf32> to vector<8x256xf32>
    %45 = vector.broadcast %43 : vector<1x256xf32> to vector<8x256xf32>
    %46 = arith.mulf %44, %45 : vector<8x256xf32>
    %47 = arith.addf %41, %46 : vector<8x256xf32>
    %48 = vector.extract_strided_slice %2 {offsets = [0, 7], sizes = [8, 1], strides = [1, 1]} : vector<8x8xf32> to vector<8x1xf32>
    %49 = vector.extract_strided_slice %1 {offsets = [7, 0], sizes = [1, 256], strides = [1, 1]} : vector<8x256xf32> to vector<1x256xf32>
    %50 = vector.broadcast %48 : vector<8x1xf32> to vector<8x256xf32>
    %51 = vector.broadcast %49 : vector<1x256xf32> to vector<8x256xf32>
    %52 = arith.mulf %50, %51 : vector<8x256xf32>
    %53 = arith.addf %47, %52 : vector<8x256xf32>
    %c0_7 = arith.constant 0 : index
    %c0_8 = arith.constant 0 : index
    %c0_9 = arith.constant 0 : index
    %c0_10 = arith.constant 0 : index
    %54 = vector.load %arg3[%c0_7, %c0_8, %c0_9, %c0_10] : memref<1x4x8x1xf32, #tpu.memory_space<vmem>>, vector<1x1x8x1xf32>
    %55 = vector.shape_cast %54 : vector<1x1x8x1xf32> to vector<8x1xf32>
    %56 = vector.broadcast %55 : vector<8x1xf32> to vector<8x256xf32>
    %57 = arith.addf %53, %56 : vector<8x256xf32>
    %cst = arith.constant dense<0.000000e+00> : vector<8xf32>
    %58 = vector.multi_reduction <add>, %57, %cst [1] : vector<8x256xf32> to vector<8xf32>
    %59 = vector.shape_cast %58 : vector<8xf32> to vector<8x1xf32>
    %60 = arith.mulf %4, %59 : vector<8x1xf32>
    %cst_11 = arith.constant dense<0.000000e+00> : vector<1xf32>
    %61 = vector.multi_reduction <add>, %60, %cst_11 [0] : vector<8x1xf32> to vector<1xf32>
    %62 = vector.shape_cast %61 : vector<1xf32> to vector<1x1xf32>
    %cst_12 = arith.constant 4.8828125E-4 : f32
    %63 = vector.broadcast %cst_12 : f32 to vector<1x1xf32>
    %64 = arith.mulf %62, %63 : vector<1x1xf32>
    %65 = arith.mulf %57, %57 : vector<8x256xf32>
    %cst_13 = arith.constant dense<0.000000e+00> : vector<8xf32>
    %66 = vector.multi_reduction <add>, %65, %cst_13 [1] : vector<8x256xf32> to vector<8xf32>
    %67 = vector.shape_cast %66 : vector<8xf32> to vector<8x1xf32>
    %cst_14 = arith.constant dense<0.000000e+00> : vector<1xf32>
    %68 = vector.multi_reduction <add>, %67, %cst_14 [0] : vector<8x1xf32> to vector<1xf32>
    %69 = vector.shape_cast %68 : vector<1xf32> to vector<1x1xf32>
    %cst_15 = arith.constant 4.8828125E-4 : f32
    %70 = vector.broadcast %cst_15 : f32 to vector<1x1xf32>
    %71 = arith.mulf %69, %70 : vector<1x1xf32>
    %cst_16 = arith.constant 9.99999997E-7 : f32
    %72 = vector.broadcast %cst_16 : f32 to vector<1x1xf32>
    %73 = arith.maximumf %71, %72 : vector<1x1xf32>
    %74 = tpu.reciprocal %73 {approx = true} : vector<1x1xf32> -> vector<1x1xf32>
    %75 = arith.mulf %73, %74 : vector<1x1xf32>
    %cst_17 = arith.constant 2.000000e+00 : f32
    %76 = vector.broadcast %cst_17 : f32 to vector<1x1xf32>
    %77 = arith.subf %76, %75 : vector<1x1xf32>
    %78 = arith.mulf %74, %77 : vector<1x1xf32>
    %79 = arith.mulf %64, %78 : vector<1x1xf32>
    %cst_18 = arith.constant 1.000000e+00 : f32
    %80 = vector.broadcast %cst_18 : f32 to vector<1x1xf32>
    %81 = arith.subf %80, %79 : vector<1x1xf32>
    %82 = vector.broadcast %81 : vector<1x1xf32> to vector<8x256xf32>
    %83 = arith.mulf %57, %82 : vector<8x256xf32>
    %84 = arith.addf %83, %6 : vector<8x256xf32>
    %cst_19 = arith.constant -2.500000e-01 : f32
    %85 = vector.broadcast %cst_19 : f32 to vector<8x256xf32>
    %86 = arith.mulf %85, %84 : vector<8x256xf32>
    %87 = arith.addf %1, %86 : vector<8x256xf32>
    %88 = vector.extract_strided_slice %2 {offsets = [0, 0], sizes = [8, 1], strides = [1, 1]} : vector<8x8xf32> to vector<8x1xf32>
    %89 = vector.extract_strided_slice %87 {offsets = [0, 0], sizes = [1, 256], strides = [1, 1]} : vector<8x256xf32> to vector<1x256xf32>
    %90 = vector.broadcast %88 : vector<8x1xf32> to vector<8x256xf32>
    %91 = vector.broadcast %89 : vector<1x256xf32> to vector<8x256xf32>
    %92 = arith.mulf %90, %91 : vector<8x256xf32>
    %93 = vector.extract_strided_slice %2 {offsets = [0, 1], sizes = [8, 1], strides = [1, 1]} : vector<8x8xf32> to vector<8x1xf32>
    %94 = vector.extract_strided_slice %87 {offsets = [1, 0], sizes = [1, 256], strides = [1, 1]} : vector<8x256xf32> to vector<1x256xf32>
    %95 = vector.broadcast %93 : vector<8x1xf32> to vector<8x256xf32>
    %96 = vector.broadcast %94 : vector<1x256xf32> to vector<8x256xf32>
    %97 = arith.mulf %95, %96 : vector<8x256xf32>
    %98 = arith.addf %92, %97 : vector<8x256xf32>
    %99 = vector.extract_strided_slice %2 {offsets = [0, 2], sizes = [8, 1], strides = [1, 1]} : vector<8x8xf32> to vector<8x1xf32>
    %100 = vector.extract_strided_slice %87 {offsets = [2, 0], sizes = [1, 256], strides = [1, 1]} : vector<8x256xf32> to vector<1x256xf32>
    %101 = vector.broadcast %99 : vector<8x1xf32> to vector<8x256xf32>
    %102 = vector.broadcast %100 : vector<1x256xf32> to vector<8x256xf32>
    %103 = arith.mulf %101, %102 : vector<8x256xf32>
    %104 = arith.addf %98, %103 : vector<8x256xf32>
    %105 = vector.extract_strided_slice %2 {offsets = [0, 3], sizes = [8, 1], strides = [1, 1]} : vector<8x8xf32> to vector<8x1xf32>
    %106 = vector.extract_strided_slice %87 {offsets = [3, 0], sizes = [1, 256], strides = [1, 1]} : vector<8x256xf32> to vector<1x256xf32>
    %107 = vector.broadcast %105 : vector<8x1xf32> to vector<8x256xf32>
    %108 = vector.broadcast %106 : vector<1x256xf32> to vector<8x256xf32>
    %109 = arith.mulf %107, %108 : vector<8x256xf32>
    %110 = arith.addf %104, %109 : vector<8x256xf32>
    %111 = vector.extract_strided_slice %2 {offsets = [0, 4], sizes = [8, 1], strides = [1, 1]} : vector<8x8xf32> to vector<8x1xf32>
    %112 = vector.extract_strided_slice %87 {offsets = [4, 0], sizes = [1, 256], strides = [1, 1]} : vector<8x256xf32> to vector<1x256xf32>
    %113 = vector.broadcast %111 : vector<8x1xf32> to vector<8x256xf32>
    %114 = vector.broadcast %112 : vector<1x256xf32> to vector<8x256xf32>
    %115 = arith.mulf %113, %114 : vector<8x256xf32>
    %116 = arith.addf %110, %115 : vector<8x256xf32>
    %117 = vector.extract_strided_slice %2 {offsets = [0, 5], sizes = [8, 1], strides = [1, 1]} : vector<8x8xf32> to vector<8x1xf32>
    %118 = vector.extract_strided_slice %87 {offsets = [5, 0], sizes = [1, 256], strides = [1, 1]} : vector<8x256xf32> to vector<1x256xf32>
    %119 = vector.broadcast %117 : vector<8x1xf32> to vector<8x256xf32>
    %120 = vector.broadcast %118 : vector<1x256xf32> to vector<8x256xf32>
    %121 = arith.mulf %119, %120 : vector<8x256xf32>
    %122 = arith.addf %116, %121 : vector<8x256xf32>
    %123 = vector.extract_strided_slice %2 {offsets = [0, 6], sizes = [8, 1], strides = [1, 1]} : vector<8x8xf32> to vector<8x1xf32>
    %124 = vector.extract_strided_slice %87 {offsets = [6, 0], sizes = [1, 256], strides = [1, 1]} : vector<8x256xf32> to vector<1x256xf32>
    %125 = vector.broadcast %123 : vector<8x1xf32> to vector<8x256xf32>
    %126 = vector.broadcast %124 : vector<1x256xf32> to vector<8x256xf32>
    %127 = arith.mulf %125, %126 : vector<8x256xf32>
    %128 = arith.addf %122, %127 : vector<8x256xf32>
    %129 = vector.extract_strided_slice %2 {offsets = [0, 7], sizes = [8, 1], strides = [1, 1]} : vector<8x8xf32> to vector<8x1xf32>
    %130 = vector.extract_strided_slice %87 {offsets = [7, 0], sizes = [1, 256], strides = [1, 1]} : vector<8x256xf32> to vector<1x256xf32>
    %131 = vector.broadcast %129 : vector<8x1xf32> to vector<8x256xf32>
    %132 = vector.broadcast %130 : vector<1x256xf32> to vector<8x256xf32>
    %133 = arith.mulf %131, %132 : vector<8x256xf32>
    %134 = arith.addf %128, %133 : vector<8x256xf32>
    %c0_20 = arith.constant 0 : index
    %c1 = arith.constant 1 : index
    %c0_21 = arith.constant 0 : index
    %c0_22 = arith.constant 0 : index
    %135 = vector.load %arg3[%c0_20, %c1, %c0_21, %c0_22] : memref<1x4x8x1xf32, #tpu.memory_space<vmem>>, vector<1x1x8x1xf32>
    %136 = vector.shape_cast %135 : vector<1x1x8x1xf32> to vector<8x1xf32>
    %137 = vector.broadcast %136 : vector<8x1xf32> to vector<8x256xf32>
    %138 = arith.addf %134, %137 : vector<8x256xf32>
    %cst_23 = arith.constant dense<0.000000e+00> : vector<8xf32>
    %139 = vector.multi_reduction <add>, %138, %cst_23 [1] : vector<8x256xf32> to vector<8xf32>
    %140 = vector.shape_cast %139 : vector<8xf32> to vector<8x1xf32>
    %141 = arith.mulf %4, %140 : vector<8x1xf32>
    %cst_24 = arith.constant dense<0.000000e+00> : vector<1xf32>
    %142 = vector.multi_reduction <add>, %141, %cst_24 [0] : vector<8x1xf32> to vector<1xf32>
    %143 = vector.shape_cast %142 : vector<1xf32> to vector<1x1xf32>
    %cst_25 = arith.constant 4.8828125E-4 : f32
    %144 = vector.broadcast %cst_25 : f32 to vector<1x1xf32>
    %145 = arith.mulf %143, %144 : vector<1x1xf32>
    %146 = arith.mulf %138, %138 : vector<8x256xf32>
    %cst_26 = arith.constant dense<0.000000e+00> : vector<8xf32>
    %147 = vector.multi_reduction <add>, %146, %cst_26 [1] : vector<8x256xf32> to vector<8xf32>
    %148 = vector.shape_cast %147 : vector<8xf32> to vector<8x1xf32>
    %cst_27 = arith.constant dense<0.000000e+00> : vector<1xf32>
    %149 = vector.multi_reduction <add>, %148, %cst_27 [0] : vector<8x1xf32> to vector<1xf32>
    %150 = vector.shape_cast %149 : vector<1xf32> to vector<1x1xf32>
    %cst_28 = arith.constant 4.8828125E-4 : f32
    %151 = vector.broadcast %cst_28 : f32 to vector<1x1xf32>
    %152 = arith.mulf %150, %151 : vector<1x1xf32>
    %cst_29 = arith.constant 9.99999997E-7 : f32
    %153 = vector.broadcast %cst_29 : f32 to vector<1x1xf32>
    %154 = arith.maximumf %152, %153 : vector<1x1xf32>
    %155 = tpu.reciprocal %154 {approx = true} : vector<1x1xf32> -> vector<1x1xf32>
    %156 = arith.mulf %154, %155 : vector<1x1xf32>
    %cst_30 = arith.constant 2.000000e+00 : f32
    %157 = vector.broadcast %cst_30 : f32 to vector<1x1xf32>
    %158 = arith.subf %157, %156 : vector<1x1xf32>
    %159 = arith.mulf %155, %158 : vector<1x1xf32>
    %160 = arith.mulf %145, %159 : vector<1x1xf32>
    %cst_31 = arith.constant 1.000000e+00 : f32
    %161 = vector.broadcast %cst_31 : f32 to vector<1x1xf32>
    %162 = arith.subf %161, %160 : vector<1x1xf32>
    %163 = vector.broadcast %162 : vector<1x1xf32> to vector<8x256xf32>
    %164 = arith.mulf %138, %163 : vector<8x256xf32>
    %165 = arith.addf %164, %6 : vector<8x256xf32>
    %cst_32 = arith.constant -2.500000e-01 : f32
    %166 = vector.broadcast %cst_32 : f32 to vector<8x256xf32>
    %167 = arith.mulf %166, %165 : vector<8x256xf32>
    %168 = arith.addf %87, %167 : vector<8x256xf32>
    %169 = vector.extract_strided_slice %2 {offsets = [0, 0], sizes = [8, 1], strides = [1, 1]} : vector<8x8xf32> to vector<8x1xf32>
    %170 = vector.extract_strided_slice %168 {offsets = [0, 0], sizes = [1, 256], strides = [1, 1]} : vector<8x256xf32> to vector<1x256xf32>
    %171 = vector.broadcast %169 : vector<8x1xf32> to vector<8x256xf32>
    %172 = vector.broadcast %170 : vector<1x256xf32> to vector<8x256xf32>
    %173 = arith.mulf %171, %172 : vector<8x256xf32>
    %174 = vector.extract_strided_slice %2 {offsets = [0, 1], sizes = [8, 1], strides = [1, 1]} : vector<8x8xf32> to vector<8x1xf32>
    %175 = vector.extract_strided_slice %168 {offsets = [1, 0], sizes = [1, 256], strides = [1, 1]} : vector<8x256xf32> to vector<1x256xf32>
    %176 = vector.broadcast %174 : vector<8x1xf32> to vector<8x256xf32>
    %177 = vector.broadcast %175 : vector<1x256xf32> to vector<8x256xf32>
    %178 = arith.mulf %176, %177 : vector<8x256xf32>
    %179 = arith.addf %173, %178 : vector<8x256xf32>
    %180 = vector.extract_strided_slice %2 {offsets = [0, 2], sizes = [8, 1], strides = [1, 1]} : vector<8x8xf32> to vector<8x1xf32>
    %181 = vector.extract_strided_slice %168 {offsets = [2, 0], sizes = [1, 256], strides = [1, 1]} : vector<8x256xf32> to vector<1x256xf32>
    %182 = vector.broadcast %180 : vector<8x1xf32> to vector<8x256xf32>
    %183 = vector.broadcast %181 : vector<1x256xf32> to vector<8x256xf32>
    %184 = arith.mulf %182, %183 : vector<8x256xf32>
    %185 = arith.addf %179, %184 : vector<8x256xf32>
    %186 = vector.extract_strided_slice %2 {offsets = [0, 3], sizes = [8, 1], strides = [1, 1]} : vector<8x8xf32> to vector<8x1xf32>
    %187 = vector.extract_strided_slice %168 {offsets = [3, 0], sizes = [1, 256], strides = [1, 1]} : vector<8x256xf32> to vector<1x256xf32>
    %188 = vector.broadcast %186 : vector<8x1xf32> to vector<8x256xf32>
    %189 = vector.broadcast %187 : vector<1x256xf32> to vector<8x256xf32>
    %190 = arith.mulf %188, %189 : vector<8x256xf32>
    %191 = arith.addf %185, %190 : vector<8x256xf32>
    %192 = vector.extract_strided_slice %2 {offsets = [0, 4], sizes = [8, 1], strides = [1, 1]} : vector<8x8xf32> to vector<8x1xf32>
    %193 = vector.extract_strided_slice %168 {offsets = [4, 0], sizes = [1, 256], strides = [1, 1]} : vector<8x256xf32> to vector<1x256xf32>
    %194 = vector.broadcast %192 : vector<8x1xf32> to vector<8x256xf32>
    %195 = vector.broadcast %193 : vector<1x256xf32> to vector<8x256xf32>
    %196 = arith.mulf %194, %195 : vector<8x256xf32>
    %197 = arith.addf %191, %196 : vector<8x256xf32>
    %198 = vector.extract_strided_slice %2 {offsets = [0, 5], sizes = [8, 1], strides = [1, 1]} : vector<8x8xf32> to vector<8x1xf32>
    %199 = vector.extract_strided_slice %168 {offsets = [5, 0], sizes = [1, 256], strides = [1, 1]} : vector<8x256xf32> to vector<1x256xf32>
    %200 = vector.broadcast %198 : vector<8x1xf32> to vector<8x256xf32>
    %201 = vector.broadcast %199 : vector<1x256xf32> to vector<8x256xf32>
    %202 = arith.mulf %200, %201 : vector<8x256xf32>
    %203 = arith.addf %197, %202 : vector<8x256xf32>
    %204 = vector.extract_strided_slice %2 {offsets = [0, 6], sizes = [8, 1], strides = [1, 1]} : vector<8x8xf32> to vector<8x1xf32>
    %205 = vector.extract_strided_slice %168 {offsets = [6, 0], sizes = [1, 256], strides = [1, 1]} : vector<8x256xf32> to vector<1x256xf32>
    %206 = vector.broadcast %204 : vector<8x1xf32> to vector<8x256xf32>
    %207 = vector.broadcast %205 : vector<1x256xf32> to vector<8x256xf32>
    %208 = arith.mulf %206, %207 : vector<8x256xf32>
    %209 = arith.addf %203, %208 : vector<8x256xf32>
    %210 = vector.extract_strided_slice %2 {offsets = [0, 7], sizes = [8, 1], strides = [1, 1]} : vector<8x8xf32> to vector<8x1xf32>
    %211 = vector.extract_strided_slice %168 {offsets = [7, 0], sizes = [1, 256], strides = [1, 1]} : vector<8x256xf32> to vector<1x256xf32>
    %212 = vector.broadcast %210 : vector<8x1xf32> to vector<8x256xf32>
    %213 = vector.broadcast %211 : vector<1x256xf32> to vector<8x256xf32>
    %214 = arith.mulf %212, %213 : vector<8x256xf32>
    %215 = arith.addf %209, %214 : vector<8x256xf32>
    %c0_33 = arith.constant 0 : index
    %c2 = arith.constant 2 : index
    %c0_34 = arith.constant 0 : index
    %c0_35 = arith.constant 0 : index
    %216 = vector.load %arg3[%c0_33, %c2, %c0_34, %c0_35] : memref<1x4x8x1xf32, #tpu.memory_space<vmem>>, vector<1x1x8x1xf32>
    %217 = vector.shape_cast %216 : vector<1x1x8x1xf32> to vector<8x1xf32>
    %218 = vector.broadcast %217 : vector<8x1xf32> to vector<8x256xf32>
    %219 = arith.addf %215, %218 : vector<8x256xf32>
    %cst_36 = arith.constant dense<0.000000e+00> : vector<8xf32>
    %220 = vector.multi_reduction <add>, %219, %cst_36 [1] : vector<8x256xf32> to vector<8xf32>
    %221 = vector.shape_cast %220 : vector<8xf32> to vector<8x1xf32>
    %222 = arith.mulf %4, %221 : vector<8x1xf32>
    %cst_37 = arith.constant dense<0.000000e+00> : vector<1xf32>
    %223 = vector.multi_reduction <add>, %222, %cst_37 [0] : vector<8x1xf32> to vector<1xf32>
    %224 = vector.shape_cast %223 : vector<1xf32> to vector<1x1xf32>
    %cst_38 = arith.constant 4.8828125E-4 : f32
    %225 = vector.broadcast %cst_38 : f32 to vector<1x1xf32>
    %226 = arith.mulf %224, %225 : vector<1x1xf32>
    %227 = arith.mulf %219, %219 : vector<8x256xf32>
    %cst_39 = arith.constant dense<0.000000e+00> : vector<8xf32>
    %228 = vector.multi_reduction <add>, %227, %cst_39 [1] : vector<8x256xf32> to vector<8xf32>
    %229 = vector.shape_cast %228 : vector<8xf32> to vector<8x1xf32>
    %cst_40 = arith.constant dense<0.000000e+00> : vector<1xf32>
    %230 = vector.multi_reduction <add>, %229, %cst_40 [0] : vector<8x1xf32> to vector<1xf32>
    %231 = vector.shape_cast %230 : vector<1xf32> to vector<1x1xf32>
    %cst_41 = arith.constant 4.8828125E-4 : f32
    %232 = vector.broadcast %cst_41 : f32 to vector<1x1xf32>
    %233 = arith.mulf %231, %232 : vector<1x1xf32>
    %cst_42 = arith.constant 9.99999997E-7 : f32
    %234 = vector.broadcast %cst_42 : f32 to vector<1x1xf32>
    %235 = arith.maximumf %233, %234 : vector<1x1xf32>
    %236 = tpu.reciprocal %235 {approx = true} : vector<1x1xf32> -> vector<1x1xf32>
    %237 = arith.mulf %235, %236 : vector<1x1xf32>
    %cst_43 = arith.constant 2.000000e+00 : f32
    %238 = vector.broadcast %cst_43 : f32 to vector<1x1xf32>
    %239 = arith.subf %238, %237 : vector<1x1xf32>
    %240 = arith.mulf %236, %239 : vector<1x1xf32>
    %241 = arith.mulf %226, %240 : vector<1x1xf32>
    %cst_44 = arith.constant 1.000000e+00 : f32
    %242 = vector.broadcast %cst_44 : f32 to vector<1x1xf32>
    %243 = arith.subf %242, %241 : vector<1x1xf32>
    %244 = vector.broadcast %243 : vector<1x1xf32> to vector<8x256xf32>
    %245 = arith.mulf %219, %244 : vector<8x256xf32>
    %246 = arith.addf %245, %6 : vector<8x256xf32>
    %cst_45 = arith.constant -2.500000e-01 : f32
    %247 = vector.broadcast %cst_45 : f32 to vector<8x256xf32>
    %248 = arith.mulf %247, %246 : vector<8x256xf32>
    %249 = arith.addf %168, %248 : vector<8x256xf32>
    %250 = vector.extract_strided_slice %2 {offsets = [0, 0], sizes = [8, 1], strides = [1, 1]} : vector<8x8xf32> to vector<8x1xf32>
    %251 = vector.extract_strided_slice %249 {offsets = [0, 0], sizes = [1, 256], strides = [1, 1]} : vector<8x256xf32> to vector<1x256xf32>
    %252 = vector.broadcast %250 : vector<8x1xf32> to vector<8x256xf32>
    %253 = vector.broadcast %251 : vector<1x256xf32> to vector<8x256xf32>
    %254 = arith.mulf %252, %253 : vector<8x256xf32>
    %255 = vector.extract_strided_slice %2 {offsets = [0, 1], sizes = [8, 1], strides = [1, 1]} : vector<8x8xf32> to vector<8x1xf32>
    %256 = vector.extract_strided_slice %249 {offsets = [1, 0], sizes = [1, 256], strides = [1, 1]} : vector<8x256xf32> to vector<1x256xf32>
    %257 = vector.broadcast %255 : vector<8x1xf32> to vector<8x256xf32>
    %258 = vector.broadcast %256 : vector<1x256xf32> to vector<8x256xf32>
    %259 = arith.mulf %257, %258 : vector<8x256xf32>
    %260 = arith.addf %254, %259 : vector<8x256xf32>
    %261 = vector.extract_strided_slice %2 {offsets = [0, 2], sizes = [8, 1], strides = [1, 1]} : vector<8x8xf32> to vector<8x1xf32>
    %262 = vector.extract_strided_slice %249 {offsets = [2, 0], sizes = [1, 256], strides = [1, 1]} : vector<8x256xf32> to vector<1x256xf32>
    %263 = vector.broadcast %261 : vector<8x1xf32> to vector<8x256xf32>
    %264 = vector.broadcast %262 : vector<1x256xf32> to vector<8x256xf32>
    %265 = arith.mulf %263, %264 : vector<8x256xf32>
    %266 = arith.addf %260, %265 : vector<8x256xf32>
    %267 = vector.extract_strided_slice %2 {offsets = [0, 3], sizes = [8, 1], strides = [1, 1]} : vector<8x8xf32> to vector<8x1xf32>
    %268 = vector.extract_strided_slice %249 {offsets = [3, 0], sizes = [1, 256], strides = [1, 1]} : vector<8x256xf32> to vector<1x256xf32>
    %269 = vector.broadcast %267 : vector<8x1xf32> to vector<8x256xf32>
    %270 = vector.broadcast %268 : vector<1x256xf32> to vector<8x256xf32>
    %271 = arith.mulf %269, %270 : vector<8x256xf32>
    %272 = arith.addf %266, %271 : vector<8x256xf32>
    %273 = vector.extract_strided_slice %2 {offsets = [0, 4], sizes = [8, 1], strides = [1, 1]} : vector<8x8xf32> to vector<8x1xf32>
    %274 = vector.extract_strided_slice %249 {offsets = [4, 0], sizes = [1, 256], strides = [1, 1]} : vector<8x256xf32> to vector<1x256xf32>
    %275 = vector.broadcast %273 : vector<8x1xf32> to vector<8x256xf32>
    %276 = vector.broadcast %274 : vector<1x256xf32> to vector<8x256xf32>
    %277 = arith.mulf %275, %276 : vector<8x256xf32>
    %278 = arith.addf %272, %277 : vector<8x256xf32>
    %279 = vector.extract_strided_slice %2 {offsets = [0, 5], sizes = [8, 1], strides = [1, 1]} : vector<8x8xf32> to vector<8x1xf32>
    %280 = vector.extract_strided_slice %249 {offsets = [5, 0], sizes = [1, 256], strides = [1, 1]} : vector<8x256xf32> to vector<1x256xf32>
    %281 = vector.broadcast %279 : vector<8x1xf32> to vector<8x256xf32>
    %282 = vector.broadcast %280 : vector<1x256xf32> to vector<8x256xf32>
    %283 = arith.mulf %281, %282 : vector<8x256xf32>
    %284 = arith.addf %278, %283 : vector<8x256xf32>
    %285 = vector.extract_strided_slice %2 {offsets = [0, 6], sizes = [8, 1], strides = [1, 1]} : vector<8x8xf32> to vector<8x1xf32>
    %286 = vector.extract_strided_slice %249 {offsets = [6, 0], sizes = [1, 256], strides = [1, 1]} : vector<8x256xf32> to vector<1x256xf32>
    %287 = vector.broadcast %285 : vector<8x1xf32> to vector<8x256xf32>
    %288 = vector.broadcast %286 : vector<1x256xf32> to vector<8x256xf32>
    %289 = arith.mulf %287, %288 : vector<8x256xf32>
    %290 = arith.addf %284, %289 : vector<8x256xf32>
    %291 = vector.extract_strided_slice %2 {offsets = [0, 7], sizes = [8, 1], strides = [1, 1]} : vector<8x8xf32> to vector<8x1xf32>
    %292 = vector.extract_strided_slice %249 {offsets = [7, 0], sizes = [1, 256], strides = [1, 1]} : vector<8x256xf32> to vector<1x256xf32>
    %293 = vector.broadcast %291 : vector<8x1xf32> to vector<8x256xf32>
    %294 = vector.broadcast %292 : vector<1x256xf32> to vector<8x256xf32>
    %295 = arith.mulf %293, %294 : vector<8x256xf32>
    %296 = arith.addf %290, %295 : vector<8x256xf32>
    %c0_46 = arith.constant 0 : index
    %c3 = arith.constant 3 : index
    %c0_47 = arith.constant 0 : index
    %c0_48 = arith.constant 0 : index
    %297 = vector.load %arg3[%c0_46, %c3, %c0_47, %c0_48] : memref<1x4x8x1xf32, #tpu.memory_space<vmem>>, vector<1x1x8x1xf32>
    %298 = vector.shape_cast %297 : vector<1x1x8x1xf32> to vector<8x1xf32>
    %299 = vector.broadcast %298 : vector<8x1xf32> to vector<8x256xf32>
    %300 = arith.addf %296, %299 : vector<8x256xf32>
    %cst_49 = arith.constant dense<0.000000e+00> : vector<8xf32>
    %301 = vector.multi_reduction <add>, %300, %cst_49 [1] : vector<8x256xf32> to vector<8xf32>
    %302 = vector.shape_cast %301 : vector<8xf32> to vector<8x1xf32>
    %303 = arith.mulf %4, %302 : vector<8x1xf32>
    %cst_50 = arith.constant dense<0.000000e+00> : vector<1xf32>
    %304 = vector.multi_reduction <add>, %303, %cst_50 [0] : vector<8x1xf32> to vector<1xf32>
    %305 = vector.shape_cast %304 : vector<1xf32> to vector<1x1xf32>
    %cst_51 = arith.constant 4.8828125E-4 : f32
    %306 = vector.broadcast %cst_51 : f32 to vector<1x1xf32>
    %307 = arith.mulf %305, %306 : vector<1x1xf32>
    %308 = arith.mulf %300, %300 : vector<8x256xf32>
    %cst_52 = arith.constant dense<0.000000e+00> : vector<8xf32>
    %309 = vector.multi_reduction <add>, %308, %cst_52 [1] : vector<8x256xf32> to vector<8xf32>
    %310 = vector.shape_cast %309 : vector<8xf32> to vector<8x1xf32>
    %cst_53 = arith.constant dense<0.000000e+00> : vector<1xf32>
    %311 = vector.multi_reduction <add>, %310, %cst_53 [0] : vector<8x1xf32> to vector<1xf32>
    %312 = vector.shape_cast %311 : vector<1xf32> to vector<1x1xf32>
    %cst_54 = arith.constant 4.8828125E-4 : f32
    %313 = vector.broadcast %cst_54 : f32 to vector<1x1xf32>
    %314 = arith.mulf %312, %313 : vector<1x1xf32>
    %cst_55 = arith.constant 9.99999997E-7 : f32
    %315 = vector.broadcast %cst_55 : f32 to vector<1x1xf32>
    %316 = arith.maximumf %314, %315 : vector<1x1xf32>
    %317 = tpu.reciprocal %316 {approx = true} : vector<1x1xf32> -> vector<1x1xf32>
    %318 = arith.mulf %316, %317 : vector<1x1xf32>
    %cst_56 = arith.constant 2.000000e+00 : f32
    %319 = vector.broadcast %cst_56 : f32 to vector<1x1xf32>
    %320 = arith.subf %319, %318 : vector<1x1xf32>
    %321 = arith.mulf %317, %320 : vector<1x1xf32>
    %322 = arith.mulf %307, %321 : vector<1x1xf32>
    %cst_57 = arith.constant 1.000000e+00 : f32
    %323 = vector.broadcast %cst_57 : f32 to vector<1x1xf32>
    %324 = arith.subf %323, %322 : vector<1x1xf32>
    %325 = vector.broadcast %324 : vector<1x1xf32> to vector<8x256xf32>
    %326 = arith.mulf %300, %325 : vector<8x256xf32>
    %327 = arith.addf %326, %6 : vector<8x256xf32>
    %cst_58 = arith.constant -2.500000e-01 : f32
    %328 = vector.broadcast %cst_58 : f32 to vector<8x256xf32>
    %329 = arith.mulf %328, %327 : vector<8x256xf32>
    %330 = arith.addf %249, %329 : vector<8x256xf32>
    %c0_59 = arith.constant 0 : index
    %c0_60 = arith.constant 0 : index
    %c0_61 = arith.constant 0 : index
    %331 = vector.load %arg5[%c0_59, %c0_60, %c0_61] : memref<1x8x256xf32, #tpu.memory_space<vmem>>, vector<1x8x256xf32>
    %332 = vector.shape_cast %331 : vector<1x8x256xf32> to vector<8x256xf32>
    %333 = vector.shape_cast %330 : vector<8x256xf32> to vector<1x8x256xf32>
    tpu.vector_store %arg5[%c0_59, %c0_60, %c0_61], %333 {strides = array<i32>} : memref<1x8x256xf32, #tpu.memory_space<vmem>>, vector<1x8x256xf32>,
    return
  }
  func.func @transform_0(%arg0: i32) -> (i32, i32, i32) {
    %c0_i32 = arith.constant 0 : i32
    %c0_i32_0 = arith.constant 0 : i32
    %c0_i32_1 = arith.constant 0 : i32
    return %arg0, %c0_i32, %c0_i32_0 : i32, i32, i32
  }
  func.func @transform_1(%arg0: i32) -> (i32, i32) {
    %c0_i32 = arith.constant 0 : i32
    %c0_i32_0 = arith.constant 0 : i32
    %c0_i32_1 = arith.constant 0 : i32
    return %c0_i32, %c0_i32_0 : i32, i32
  }
  func.func @transform_2(%arg0: i32) -> (i32, i32, i32, i32) {
    %c0_i32 = arith.constant 0 : i32
    %c0_i32_0 = arith.constant 0 : i32
    %c0_i32_1 = arith.constant 0 : i32
    %c0_i32_2 = arith.constant 0 : i32
    return %arg0, %c0_i32, %c0_i32_0, %c0_i32_1 : i32, i32, i32, i32
  }
  func.func @transform_3(%arg0: i32) -> (i32, i32, i32) {
    %c0_i32 = arith.constant 0 : i32
    %c0_i32_0 = arith.constant 0 : i32
    %c0_i32_1 = arith.constant 0 : i32
    return %arg0, %c0_i32, %c0_i32_0 : i32, i32, i32
  }
  func.func @transform_4(%arg0: i32) -> (i32, i32, i32) {
    %c0_i32 = arith.constant 0 : i32
    %c0_i32_0 = arith.constant 0 : i32
    %c0_i32_1 = arith.constant 0 : i32
    return %arg0, %c0_i32, %c0_i32_0 : i32, i32, i32
  }
}

</mosaic_0001>

<bundles_post_ra>
// kernel: gaussian_flow_forward_test.1
= control target key start
LH: loop header
LB: loop body
LE: loop exit
PB: predicated region body
PF: predicated region fallthrough
CT: control target
= control target key end

     0   :  { %s850_s15 = smov 0   ;;  %s1080_s0 = inlined_call_operand.vmem [shape: f32[2,8,256], index: 0, kind: input, shape index: {}]   ;;  %s1081_s1 = inlined_call_operand.vmem [shape: f32[8,8], index: 1, kind: input, shape index: {}]   ;;  %s1082_s2 = inlined_call_operand.vmem [shape: f32[2,4,8,1], index: 2, kind: input, shape index: {}]   ;;  %s1083_s3 = inlined_call_operand.vmem [shape: f32[2,8,1], index: 3, kind: input, shape index: {}]   ;;  %s1084_s4 = inlined_call_operand.vmem [shape: f32[2,8,256], index: 4, kind: output, shape index: {}]  }
   0x1 LB: > { %s754_s16 = sadd.s32 4294967295, %s815_s15   ;;  %p758_p0 = scmp.ge.s32.totalorder %s815_s15, 1  ;;  %s815_s15 = sphi %s850_s15, %s14_s15  }
   0x2   : > { %p181_p1 = scmp.lt.s32.totalorder %s815_s15, 3 }
   0x4   : > { %p182_p2 = pnand %p758_p0, %p181_p1 }
   0x5   : > { %p216_p3 = scmp.lt.s32.totalorder (!%p182_p2), %s754_s16, 1 }
   0x6   : > { %185 = sbr.rel (%p182_p2) target bundleno = 1303 (0x517), region = 36 }
   0xb   : > { %v237_v0 = vld [vmem:[%s1081_s1] sm:$0xff]  ;;  %v817_v1 = vmov 0   ;;  %v818_v2 = vmov 2   ;;  %v819_v3 = vmov 4   ;;  %s1086_s16 = smov (!%p216_p3, %s754_s16), 1  ;;  %v820_v4 = vmov 1  }
   0xc   : > { %790 = vset.pattern.permute.xlu0 %v817_v1  ;;  %792 = vset.pattern.permute.xlu1 %v818_v2  ;;  %v821_v5 = vmov 3   ;;  %s772_s19 = sshll.u32 %s1086_s16, 5  ;;  %v822_v6 = vmov 5   ;;  %v823_v8 = vmov 6   ;;  %v824_v9 = vmov 7   ;;  %s771_s23 = sshll.u32 %s1086_s16, 4 }
   0xd   : > { %246 = vperm.xlu0 %790, %v237_v0   ;;  %264 = vperm.xlu1 %792, %v237_v0   ;;  %s867_s22 = scalar_lea.vmem %s1082_s2, %s772_s19  ;;  %s220_s26 = scalar_lea.vmem %s1080_s0, %s771_s23  ;;  %vm335_vm0 = vcmask 7168  }
   0xe   : > { %794 = vset.pattern.permute.xlu2 %v819_v3  ;;  %v323_v7 = vld [vmem:[%s867_s22] sm:$0xff]  ;;  %v884_v14 = vld [vmem:[%s220_s26 + $0x8] sm:$0xff]  ;;  %s763_s27 = sshll.u32 %s1086_s16, 3  ;;  %s234_s7 = scalar_lea.vmem %s1084_s4, %s771_s23 }
   0xf   : > { %284 = vperm.xlu2 %794, %v237_v0   ;;  %v882_v13 = vld [vmem:[%s220_s26] sm:$0xff]  ;;  %v250_v16 = vperm.slane %v884_v14, 0  ;;  %v258_v18 = vperm.slane %v884_v14, 1  ;;  %v268_v21 = vperm.slane %v884_v14, 2  ;;  %v278_v25 = vperm.slane %v884_v14, 3  ;;  %s229_s30 = scalar_lea.vmem %s1083_s3, %s763_s27 }
  0x10   : > { %v249_v15 = vperm.slane %v882_v13, 0  ;;  %v257_v17 = vperm.slane %v882_v13, 1  ;;  %v267_v20 = vperm.slane %v882_v13, 2  ;;  %v277_v24 = vperm.slane %v882_v13, 3 }
  0x11   : > { %v287_v30 = vperm.slane %v882_v13, 4  ;;  %v288_v31 = vperm.slane %v884_v14, 4  ;;  %v297_v36 = vperm.slane %v882_v13, 5  ;;  %v298_v37 = vperm.slane %v884_v14, 5 }
  0x12   : > { %v307_v44 = vperm.slane %v882_v13, 6  ;;  %v308_v45 = vperm.slane %v884_v14, 6  ;;  %v317_v48 = vperm.slane %v882_v13, 7  ;;  %v318_v49 = vperm.slane %v884_v14, 7 }
  0x15   : > { %791 = vset.pattern.permute.xlu0 %v820_v4  ;;  %793 = vset.pattern.permute.xlu1 %v821_v5 }
  0x16   : > { %254 = vperm.xlu0 %791, %v237_v0   ;;  %274 = vperm.xlu1 %793, %v237_v0  }
  0x17   : > { %795 = vset.pattern.permute.xlu2 %v822_v6 }
  0x18   : > { %294 = vperm.xlu2 %795, %v237_v0  }
  0x1e   : > { %796 = vset.pattern.permute.xlu1 %v823_v8  ;;  %798 = vset.pattern.permute.xlu0 %v817_v1 }
  0x1f   : > { %304 = vperm.xlu1 %796, %v237_v0   ;;  %326 = vperm.xlu0 %798, %v323_v7  }
  0x20   : > { %797 = vset.pattern.permute.xlu2 %v824_v9  ;;  %v932_v9 = vld [vmem:[%s229_s30] sm:$0xff] }
  0x21   : > { %314 = vperm.xlu2 %797, %v237_v0  }
  0x27   : > { %799 = vset.pattern.permute.xlu1 %v817_v1 }
  0x29   : > { %800 = vset.pattern.permute.xlu2 %v817_v1 }
  0x69   : > { %v871_v10 = vpop.permute.xlu2 %284 }
  0x6a   : > { %v289_v42 = vmul.f32 %v287_v30, %v871_v10  ;;  %v290_v43 = vmul.f32 %v288_v31, %v871_v10 }
  0x72   : > { %v890_v19 = vpop.permute.xlu2 %294 }
  0x73   : > { %v299_v54 = vmul.f32 %v297_v36, %v890_v19  ;;  %v300_v55 = vmul.f32 %v298_v37, %v890_v19 }
  0x7b   : > { %v918_v50 = vpop.permute.xlu2 %314 }
  0x7c   : > { %v319_v60 = vmul.f32 %v317_v48, %v918_v50  ;;  %v320_v61 = vmul.f32 %v318_v49, %v918_v50 }
  0x7f   : > { %v878_v11 = vpop.permute.xlu0 %246  ;;  %v880_v12 = vpop.permute.xlu1 %264 }
  0x80   : > { %v251_v26 = vmul.f32 %v249_v15, %v878_v11  ;;  %v252_v27 = vmul.f32 %v250_v16, %v878_v11  ;;  %v269_v34 = vmul.f32 %v267_v20, %v880_v12  ;;  %v270_v35 = vmul.f32 %v268_v21, %v880_v12 }
  0x88   : > { %v894_v22 = vpop.permute.xlu0 %254  ;;  %v896_v23 = vpop.permute.xlu1 %274 }
  0x89   : > { %v259_v28 = vmul.f32 %v257_v17, %v894_v22  ;;  %v260_v29 = vmul.f32 %v258_v18, %v894_v22  ;;  %v279_v40 = vmul.f32 %v277_v24, %v896_v23  ;;  %v280_v41 = vmul.f32 %v278_v25, %v896_v23 }
  0x8b   : > { %v261_v32 = vadd.f32 %v259_v28, %v251_v26  ;;  %v262_v33 = vadd.f32 %v260_v29, %v252_v27 }
  0x8d   : > { %v271_v38 = vadd.f32 %v269_v34, %v261_v32  ;;  %v272_v39 = vadd.f32 %v270_v35, %v262_v33 }
  0x8f   : > { %v281_v46 = vadd.f32 %v279_v40, %v271_v38  ;;  %v282_v47 = vadd.f32 %v280_v41, %v272_v39 }
  0x91   : > { %v920_v51 = vpop.permute.xlu1 %304  ;;  %v291_v52 = vadd.f32 %v289_v42, %v281_v46  ;;  %v292_v53 = vadd.f32 %v290_v43, %v282_v47  ;;  %v327_v0 = vpop.permute.xlu0 %326  ;;  %v766_v43 = vld [vmem:[%s867_s22 + $0x8] sm:$0xff] }
  0x92   : > { %v309_v56 = vmul.f32 %v307_v44, %v920_v51  ;;  %v310_v57 = vmul.f32 %v308_v45, %v920_v51 }
  0x93   : > { %v301_v58 = vadd.f32 %v299_v54, %v291_v52  ;;  %v302_v59 = vadd.f32 %v300_v55, %v292_v53 }
  0x95   : > { %v311_v62 = vadd.f32 %v309_v56, %v301_v58  ;;  %v312_v63 = vadd.f32 %v310_v57, %v302_v59 }
  0x97   : > { %v321_v1 = vadd.f32 %v319_v60, %v311_v62  ;;  %v322_v2 = vadd.f32 %v320_v61, %v312_v63 }
  0x99   : > { %v329_v3 = vadd.f32 %v327_v0, %v321_v1  ;;  %v330_v4 = vadd.f32 %v327_v0, %v322_v2 }
  0x9b   : > { %v331_v5 = vadd.f32 %v330_v4, %v329_v3  ;;  %v344_v6 = vmul.f32 %v329_v3, %v329_v3  ;;  %v345_v7 = vmul.f32 %v330_v4, %v330_v4 }
  0x9d   : > { %332 = vadd.xlane.f32.xlu2 %v331_v5  ;;  %v346_v8 = vadd.f32 %v345_v7, %v344_v6 }
  0x9f   : > { %347 = vadd.xlane.f32.xlu1 %v346_v8 }
 0x110   : > { %v333_v15 = vpop.xlane.xlu2 %332 }
 0x111   : > { %v334_v16 = vmul.f32 %v333_v15, %v932_v9 }
 0x112   : > { %v348_v17 = vpop.xlane.xlu1 %347 }
 0x113   : > { %v336_v18 = vsel %vm335_vm0, %v334_v16, 0.0  ;;  %v349_v20 = vrot.slane %v348_v17, 4 }
 0x114   : > { %v337_v24 = vrot.slane %v336_v18, 4 }
 0x115   : > { %v350_v21 = vadd.f32 %v349_v20, %v348_v17 }
 0x116   : > { %v338_v27 = vadd.f32 %v337_v24, %v336_v18 }
 0x117   : > { %v351_v25 = vrot.slane %v350_v21, 2 }
 0x118   : > { %v339_v30 = vrot.slane %v338_v27, 2 }
 0x119   : > { %v352_v26 = vadd.f32 %v351_v25, %v350_v21 }
 0x11a   : > { %v340_v33 = vadd.f32 %v339_v30, %v338_v27 }
 0x11b   : > { %v353_v28 = vrot.slane %v352_v26, 1 }
 0x11c   : > { %v341_v34 = vrot.slane %v340_v33, 1 }
 0x11d   : > { %v354_v29 = vadd.f32 %v353_v28, %v352_v26 }
 0x11e   : > { %v342_v37 = vadd.f32 %v341_v34, %v340_v33 }
 0x11f   : > { %v355_v31 = vmul.f32 0.00048828125, %v354_v29 }
 0x120   : > { %v343_v39 = vmul.f32 0.00048828125, %v342_v37 }
 0x121   : > { %v356_v32 = vmax.f32 %v355_v31, 1e-06 }
 0x123   : > { %801 = vrcp.f32 %v356_v32 }
 0x129   : > { %v802_v35 = vpop.eup %801 }
 0x12a   : > { %v358_v36 = vmul.f32 %v802_v35, %v356_v32 }
 0x12c   : > { %v359_v38 = vsub.f32 2.0, %v358_v36 }
 0x12e   : > { %v360_v40 = vmul.f32 %v802_v35, %v359_v38 }
 0x130   : > { %v361_v41 = vmul.f32 %v360_v40, %v343_v39 }
 0x132   : > { %v362_v42 = vsub.f32 1.0, %v361_v41 }
 0x134   : > { %365 = vperm.xlu0 %798, %v362_v42  }
 0x13c   : > { %241 = vperm.xlu0 %798, %v932_v9  }
 0x144   : > { %426 = vperm.xlu0 %798, %v766_v43  }
 0x1a6   : > { %v366_v44 = vpop.permute.xlu0 %365 }
 0x1a7   : > { %v368_v45 = vmul.f32 %v366_v44, %v329_v3  ;;  %v369_v46 = vmul.f32 %v366_v44, %v330_v4 }
 0x1ae   : > { %v938_v47 = vpop.permute.xlu0 %241 }
 0x1af   : > { %v370_v48 = vadd.f32 %v368_v45, %v938_v47  ;;  %v371_v49 = vadd.f32 %v369_v46, %v938_v47 }
 0x1b1   : > { %v372_v52 = vmul.f32 -0.25, %v370_v48  ;;  %v373_v53 = vmul.f32 -0.25, %v371_v49 }
 0x1b3   : > { %v943_v54 = vadd.f32 %v372_v52, %v882_v13  ;;  %v946_v55 = vadd.f32 %v373_v53, %v884_v14 }
 0x1b5   : > { %v376_v56 = vperm.slane %v943_v54, 0  ;;  %v377_v57 = vperm.slane %v946_v55, 0  ;;  %v380_v58 = vperm.slane %v943_v54, 1  ;;  %v381_v59 = vperm.slane %v946_v55, 1 }
 0x1b6   : > { %v386_v60 = vperm.slane %v943_v54, 2  ;;  %v387_v61 = vperm.slane %v946_v55, 2  ;;  %v392_v62 = vperm.slane %v943_v54, 3  ;;  %v393_v13 = vperm.slane %v946_v55, 3  ;;  %v427_v45 = vpop.permute.xlu0 %426 }
 0x1b7   : > { %v378_v63 = vmul.f32 %v376_v56, %v878_v11  ;;  %v379_v14 = vmul.f32 %v377_v57, %v878_v11  ;;  %v382_v0 = vmul.f32 %v380_v58, %v894_v22  ;;  %v383_v1 = vmul.f32 %v381_v59, %v894_v22 }
 0x1b8   : > { %v388_v2 = vmul.f32 %v386_v60, %v880_v12  ;;  %v389_v3 = vmul.f32 %v387_v61, %v880_v12  ;;  %v398_v6 = vperm.slane %v943_v54, 4  ;;  %v399_v7 = vperm.slane %v946_v55, 4 }
 0x1b9   : > { %v384_v4 = vadd.f32 %v382_v0, %v378_v63  ;;  %v385_v5 = vadd.f32 %v383_v1, %v379_v14  ;;  %v404_v8 = vperm.slane %v943_v54, 5  ;;  %v405_v15 = vperm.slane %v946_v55, 5 }
 0x1ba   : > { %v394_v18 = vmul.f32 %v392_v62, %v896_v23  ;;  %v395_v20 = vmul.f32 %v393_v13, %v896_v23  ;;  %v410_v21 = vperm.slane %v943_v54, 6  ;;  %v411_v24 = vperm.slane %v946_v55, 6  ;;  %v767_v62 = vld [vmem:[%s867_s22 + $0x10] sm:$0xff] }
 0x1bb   : > { %v390_v16 = vadd.f32 %v388_v2, %v384_v4  ;;  %v391_v17 = vadd.f32 %v389_v3, %v385_v5  ;;  %v400_v27 = vmul.f32 %v398_v6, %v871_v10  ;;  %v401_v28 = vmul.f32 %v399_v7, %v871_v10 }
 0x1bc   : > { %v406_v29 = vmul.f32 %v404_v8, %v890_v19  ;;  %v407_v30 = vmul.f32 %v405_v15, %v890_v19  ;;  %v416_v33 = vperm.slane %v943_v54, 7  ;;  %v417_v34 = vperm.slane %v946_v55, 7 }
 0x1bd   : > { %v396_v25 = vadd.f32 %v394_v18, %v390_v16  ;;  %v397_v26 = vadd.f32 %v395_v20, %v391_v17  ;;  %v412_v37 = vmul.f32 %v410_v21, %v920_v51  ;;  %v413_v38 = vmul.f32 %v411_v24, %v920_v51 }
 0x1be   : > { %v418_v41 = vmul.f32 %v416_v33, %v918_v50  ;;  %v419_v42 = vmul.f32 %v417_v34, %v918_v50 }
 0x1bf   : > { %v402_v31 = vadd.f32 %v400_v27, %v396_v25  ;;  %v403_v32 = vadd.f32 %v401_v28, %v397_v26 }
 0x1c1   : > { %v408_v35 = vadd.f32 %v406_v29, %v402_v31  ;;  %v409_v36 = vadd.f32 %v407_v30, %v403_v32 }
 0x1c3   : > { %v414_v39 = vadd.f32 %v412_v37, %v408_v35  ;;  %v415_v40 = vadd.f32 %v413_v38, %v409_v36 }
 0x1c5   : > { %v420_v43 = vadd.f32 %v418_v41, %v414_v39  ;;  %v421_v44 = vadd.f32 %v419_v42, %v415_v40 }
 0x1c7   : > { %v429_v46 = vadd.f32 %v427_v45, %v420_v43  ;;  %v430_v48 = vadd.f32 %v427_v45, %v421_v44 }
 0x1c9   : > { %v431_v49 = vadd.f32 %v430_v48, %v429_v46  ;;  %v443_v52 = vmul.f32 %v429_v46, %v429_v46  ;;  %v444_v53 = vmul.f32 %v430_v48, %v430_v48 }
 0x1cb   : > { %432 = vadd.xlane.f32.xlu2 %v431_v49  ;;  %v445_v56 = vadd.f32 %v444_v53, %v443_v52 }
 0x1cd   : > { %446 = vadd.xlane.f32.xlu0 %v445_v56 }
 0x1e3   : > { %525 = vperm.xlu2 %800, %v767_v62  }
 0x23e   : > { %v433_v57 = vpop.xlane.xlu2 %432 }
 0x23f   : > { %v434_v58 = vmul.f32 %v433_v57, %v932_v9 }
 0x240   : > { %v447_v59 = vpop.xlane.xlu0 %446 }
 0x241   : > { %v435_v60 = vsel %vm335_vm0, %v434_v58, 0.0  ;;  %v448_v61 = vrot.slane %v447_v59, 4 }
 0x242   : > { %v436_v63 = vrot.slane %v435_v60, 4 }
 0x243   : > { %v449_v13 = vadd.f32 %v448_v61, %v447_v59 }
 0x244   : > { %v437_v1 = vadd.f32 %v436_v63, %v435_v60 }
 0x245   : > { %v450_v14 = vrot.slane %v449_v13, 2 }
 0x246   : > { %v438_v4 = vrot.slane %v437_v1, 2 }
 0x247   : > { %v451_v0 = vadd.f32 %v450_v14, %v449_v13 }
 0x248   : > { %v439_v7 = vadd.f32 %v438_v4, %v437_v1 }
 0x249   : > { %v452_v2 = vrot.slane %v451_v0, 1 }
 0x24a   : > { %v440_v8 = vrot.slane %v439_v7, 1 }
 0x24b   : > { %v453_v3 = vadd.f32 %v452_v2, %v451_v0 }
 0x24c   : > { %v441_v17 = vadd.f32 %v440_v8, %v439_v7 }
 0x24d   : > { %v454_v5 = vmul.f32 0.00048828125, %v453_v3 }
 0x24e   : > { %v442_v20 = vmul.f32 0.00048828125, %v441_v17 }
 0x24f   : > { %v455_v6 = vmax.f32 %v454_v5, 1e-06 }
 0x251   : > { %803 = vrcp.f32 %v455_v6 }
 0x257   : > { %v804_v15 = vpop.eup %803 }
 0x258   : > { %v457_v16 = vmul.f32 %v804_v15, %v455_v6 }
 0x25a   : > { %v458_v18 = vsub.f32 2.0, %v457_v16 }
 0x25c   : > { %v459_v21 = vmul.f32 %v804_v15, %v458_v18 }
 0x25e   : > { %v460_v24 = vmul.f32 %v459_v21, %v442_v20 }
 0x260   : > { %v461_v25 = vsub.f32 1.0, %v460_v24 }
 0x262   : > { %464 = vperm.xlu1 %799, %v461_v25   ;;  %v526_v25 = vpop.permute.xlu2 %525 }
 0x2d4   : > { %v465_v26 = vpop.permute.xlu1 %464 }
 0x2d5   : > { %v467_v27 = vmul.f32 %v465_v26, %v429_v46  ;;  %v468_v28 = vmul.f32 %v465_v26, %v430_v48 }
 0x2d7   : > { %v469_v29 = vadd.f32 %v467_v27, %v938_v47  ;;  %v470_v30 = vadd.f32 %v468_v28, %v938_v47 }
 0x2d9   : > { %v471_v31 = vmul.f32 -0.25, %v469_v29  ;;  %v472_v32 = vmul.f32 -0.25, %v470_v30 }
 0x2db   : > { %v986_v33 = vadd.f32 %v471_v31, %v943_v54  ;;  %v989_v34 = vadd.f32 %v472_v32, %v946_v55 }
 0x2dd   : > { %v475_v35 = vperm.slane %v986_v33, 0  ;;  %v476_v36 = vperm.slane %v989_v34, 0  ;;  %v479_v37 = vperm.slane %v986_v33, 1  ;;  %v480_v38 = vperm.slane %v989_v34, 1 }
 0x2de   : > { %v485_v39 = vperm.slane %v986_v33, 2  ;;  %v486_v40 = vperm.slane %v989_v34, 2  ;;  %v491_v41 = vperm.slane %v986_v33, 3  ;;  %v492_v54 = vperm.slane %v989_v34, 3 }
 0x2df   : > { %v477_v42 = vmul.f32 %v475_v35, %v878_v11  ;;  %v478_v55 = vmul.f32 %v476_v36, %v878_v11  ;;  %v481_v43 = vmul.f32 %v479_v37, %v894_v22  ;;  %v482_v44 = vmul.f32 %v480_v38, %v894_v22 }
 0x2e0   : > { %v487_v45 = vmul.f32 %v485_v39, %v880_v12  ;;  %v488_v46 = vmul.f32 %v486_v40, %v880_v12  ;;  %v497_v52 = vperm.slane %v986_v33, 4  ;;  %v498_v53 = vperm.slane %v989_v34, 4 }
 0x2e1   : > { %v483_v48 = vadd.f32 %v481_v43, %v477_v42  ;;  %v484_v49 = vadd.f32 %v482_v44, %v478_v55  ;;  %v503_v56 = vperm.slane %v986_v33, 5  ;;  %v504_v57 = vperm.slane %v989_v34, 5 }
 0x2e2   : > { %v493_v60 = vmul.f32 %v491_v41, %v896_v23  ;;  %v494_v61 = vmul.f32 %v492_v54, %v896_v23  ;;  %v509_v62 = vperm.slane %v986_v33, 6  ;;  %v510_v13 = vperm.slane %v989_v34, 6 }
 0x2e3   : > { %v489_v58 = vadd.f32 %v487_v45, %v483_v48  ;;  %v490_v59 = vadd.f32 %v488_v46, %v484_v49  ;;  %v499_v0 = vmul.f32 %v497_v52, %v871_v10  ;;  %v500_v1 = vmul.f32 %v498_v53, %v871_v10 }
 0x2e4   : > { %v505_v2 = vmul.f32 %v503_v56, %v890_v19  ;;  %v506_v3 = vmul.f32 %v504_v57, %v890_v19  ;;  %v515_v6 = vperm.slane %v986_v33, 7  ;;  %v516_v7 = vperm.slane %v989_v34, 7 }
 0x2e5   : > { %v495_v63 = vadd.f32 %v493_v60, %v489_v58  ;;  %v496_v14 = vadd.f32 %v494_v61, %v490_v59  ;;  %v511_v16 = vmul.f32 %v509_v62, %v920_v51  ;;  %v512_v17 = vmul.f32 %v510_v13, %v920_v51 }
 0x2e6   : > { %v517_v21 = vmul.f32 %v515_v6, %v918_v50  ;;  %v518_v24 = vmul.f32 %v516_v7, %v918_v50 }
 0x2e7   : > { %v501_v4 = vadd.f32 %v499_v0, %v495_v63  ;;  %v502_v5 = vadd.f32 %v500_v1, %v496_v14  ;;  %v768_v63 = vld [vmem:[%s867_s22 + $0x18] sm:$0xff] }
 0x2e9   : > { %v507_v8 = vadd.f32 %v505_v2, %v501_v4  ;;  %v508_v15 = vadd.f32 %v506_v3, %v502_v5 }
 0x2eb   : > { %v513_v18 = vadd.f32 %v511_v16, %v507_v8  ;;  %v514_v20 = vadd.f32 %v512_v17, %v508_v15 }
 0x2ed   : > { %v519_v26 = vadd.f32 %v517_v21, %v513_v18  ;;  %v520_v27 = vadd.f32 %v518_v24, %v514_v20 }
 0x2ef   : > { %v528_v28 = vadd.f32 %v526_v25, %v519_v26  ;;  %v529_v29 = vadd.f32 %v526_v25, %v520_v27 }
 0x2f1   : > { %v530_v30 = vadd.f32 %v529_v29, %v528_v28  ;;  %v542_v31 = vmul.f32 %v528_v28, %v528_v28  ;;  %v543_v32 = vmul.f32 %v529_v29, %v529_v29 }
 0x2f3   : > { %531 = vadd.xlane.f32.xlu2 %v530_v30  ;;  %v544_v35 = vadd.f32 %v543_v32, %v542_v31 }
 0x2f5   : > { %545 = vadd.xlane.f32.xlu1 %v544_v35 }
 0x366   : > { %v532_v36 = vpop.xlane.xlu2 %531 }
 0x367   : > { %v533_v37 = vmul.f32 %v532_v36, %v932_v9 }
 0x368   : > { %v546_v38 = vpop.xlane.xlu1 %545 }
 0x369   : > { %v534_v39 = vsel %vm335_vm0, %v533_v37, 0.0  ;;  %v547_v40 = vrot.slane %v546_v38, 4 }
 0x36a   : > { %v535_v54 = vrot.slane %v534_v39, 4 }
 0x36b   : > { %v548_v41 = vadd.f32 %v547_v40, %v546_v38 }
 0x36c   : > { %v536_v43 = vadd.f32 %v535_v54, %v534_v39 }
 0x36d   : > { %v549_v42 = vrot.slane %v548_v41, 2 }
 0x36e   : > { %v537_v46 = vrot.slane %v536_v43, 2 }
 0x36f   : > { %v550_v55 = vadd.f32 %v549_v42, %v548_v41 }
 0x370   : > { %v538_v52 = vadd.f32 %v537_v46, %v536_v43 }
 0x371   : > { %v551_v44 = vrot.slane %v550_v55, 1 }
 0x372   : > { %v539_v53 = vrot.slane %v538_v52, 1 }
 0x373   : > { %v552_v45 = vadd.f32 %v551_v44, %v550_v55 }
 0x374   : > { %v540_v58 = vadd.f32 %v539_v53, %v538_v52 }
 0x375   : > { %v553_v48 = vmul.f32 0.00048828125, %v552_v45 }
 0x376   : > { %v541_v60 = vmul.f32 0.00048828125, %v540_v58 }
 0x377   : > { %v554_v49 = vmax.f32 %v553_v48, 1e-06 }
 0x379   : > { %805 = vrcp.f32 %v554_v49 }
 0x37f   : > { %v806_v56 = vpop.eup %805 }
 0x380   : > { %v556_v57 = vmul.f32 %v806_v56, %v554_v49 }
 0x382   : > { %v557_v59 = vsub.f32 2.0, %v556_v57 }
 0x384   : > { %v558_v61 = vmul.f32 %v806_v56, %v557_v59 }
 0x386   : > { %v559_v62 = vmul.f32 %v558_v61, %v541_v60 }
 0x388   : > { %v560_v13 = vsub.f32 1.0, %v559_v62 }
 0x38a   : > { %563 = vperm.xlu0 %798, %v560_v13  }
 0x392   : > { %624 = vperm.xlu0 %798, %v768_v63  }
 0x3fc   : > { %v564_v14 = vpop.permute.xlu0 %563 }
 0x3fd   : > { %v566_v0 = vmul.f32 %v564_v14, %v528_v28  ;;  %v567_v1 = vmul.f32 %v564_v14, %v529_v29 }
 0x3ff   : > { %v568_v2 = vadd.f32 %v566_v0, %v938_v47  ;;  %v569_v3 = vadd.f32 %v567_v1, %v938_v47 }
 0x401   : > { %v570_v4 = vmul.f32 -0.25, %v568_v2  ;;  %v571_v5 = vmul.f32 -0.25, %v569_v3 }
 0x403   : > { %v1029_v6 = vadd.f32 %v570_v4, %v986_v33  ;;  %v1032_v7 = vadd.f32 %v571_v5, %v989_v34 }
 0x404   : > { %v625_v60 = vpop.permute.xlu0 %624 }
 0x405   : > { %v574_v8 = vperm.slane %v1029_v6, 0  ;;  %v575_v15 = vperm.slane %v1032_v7, 0  ;;  %v578_v16 = vperm.slane %v1029_v6, 1  ;;  %v579_v17 = vperm.slane %v1032_v7, 1 }
 0x406   : > { %v584_v18 = vperm.slane %v1029_v6, 2  ;;  %v585_v20 = vperm.slane %v1032_v7, 2  ;;  %v590_v21 = vperm.slane %v1029_v6, 3  ;;  %v591_v33 = vperm.slane %v1032_v7, 3 }
 0x407   : > { %v576_v24 = vmul.f32 %v574_v8, %v878_v11  ;;  %v577_v34 = vmul.f32 %v575_v15, %v878_v11  ;;  %v580_v25 = vmul.f32 %v578_v16, %v894_v22  ;;  %v581_v26 = vmul.f32 %v579_v17, %v894_v22 }
 0x408   : > { %v586_v27 = vmul.f32 %v584_v18, %v880_v12  ;;  %v587_v28 = vmul.f32 %v585_v20, %v880_v12  ;;  %v596_v31 = vperm.slane %v1029_v6, 4  ;;  %v597_v32 = vperm.slane %v1032_v7, 4 }
 0x409   : > { %v582_v29 = vadd.f32 %v580_v25, %v576_v24  ;;  %v583_v30 = vadd.f32 %v581_v26, %v577_v34  ;;  %v602_v35 = vperm.slane %v1029_v6, 5  ;;  %v603_v36 = vperm.slane %v1032_v7, 5 }
 0x40a   : > { %v592_v38 = vmul.f32 %v590_v21, %v896_v23  ;;  %v593_v22 = vmul.f32 %v591_v33, %v896_v23  ;;  %v608_v39 = vperm.slane %v1029_v6, 6  ;;  %v609_v12 = vperm.slane %v1032_v7, 6 }
 0x40b   : > { %v588_v37 = vadd.f32 %v586_v27, %v582_v29  ;;  %v589_v11 = vadd.f32 %v587_v28, %v583_v30  ;;  %v598_v54 = vmul.f32 %v596_v31, %v871_v10  ;;  %v599_v42 = vmul.f32 %v597_v32, %v871_v10 }
 0x40c   : > { %v604_v55 = vmul.f32 %v602_v35, %v890_v19  ;;  %v605_v43 = vmul.f32 %v603_v36, %v890_v19  ;;  %v614_v46 = vperm.slane %v1029_v6, 7  ;;  %v615_v23 = vperm.slane %v1032_v7, 7 }
 0x40d   : > { %v594_v40 = vadd.f32 %v592_v38, %v588_v37  ;;  %v595_v41 = vadd.f32 %v593_v22, %v589_v11  ;;  %v610_v52 = vmul.f32 %v608_v39, %v920_v51  ;;  %v611_v53 = vmul.f32 %v609_v12, %v920_v51 }
 0x40e   : > { %v616_v10 = vmul.f32 %v614_v46, %v918_v50  ;;  %v617_v58 = vmul.f32 %v615_v23, %v918_v50 }
 0x40f   : > { %v600_v44 = vadd.f32 %v598_v54, %v594_v40  ;;  %v601_v45 = vadd.f32 %v599_v42, %v595_v41 }
 0x411   : > { %v606_v48 = vadd.f32 %v604_v55, %v600_v44  ;;  %v607_v49 = vadd.f32 %v605_v43, %v601_v45 }
 0x413   : > { %v612_v56 = vadd.f32 %v610_v52, %v606_v48  ;;  %v613_v57 = vadd.f32 %v611_v53, %v607_v49 }
 0x415   : > { %v618_v59 = vadd.f32 %v616_v10, %v612_v56  ;;  %v619_v19 = vadd.f32 %v617_v58, %v613_v57 }
 0x417   : > { %v627_v61 = vadd.f32 %v625_v60, %v618_v59  ;;  %v628_v62 = vadd.f32 %v625_v60, %v619_v19 }
 0x419   : > { %v629_v13 = vadd.f32 %v628_v62, %v627_v61  ;;  %v641_v63 = vmul.f32 %v627_v61, %v627_v61  ;;  %v642_v14 = vmul.f32 %v628_v62, %v628_v62 }
 0x41b   : > { %630 = vadd.xlane.f32.xlu0 %v629_v13  ;;  %v643_v0 = vadd.f32 %v642_v14, %v641_v63 }
 0x41d   : > { %644 = vadd.xlane.f32.xlu1 %v643_v0 }
 0x48e   : > { %v631_v1 = vpop.xlane.xlu0 %630 }
 0x48f   : > { %v632_v51 = vmul.f32 %v631_v1, %v932_v9 }
 0x490   : > { %v645_v2 = vpop.xlane.xlu1 %644 }
 0x491   : > { %v633_v3 = vsel %vm335_vm0, %v632_v51, 0.0  ;;  %v646_v4 = vrot.slane %v645_v2, 4 }
 0x492   : > { %v634_v50 = vrot.slane %v633_v3, 4 }
 0x493   : > { %v647_v5 = vadd.f32 %v646_v4, %v645_v2 }
 0x494   : > { %v635_v16 = vadd.f32 %v634_v50, %v633_v3 }
 0x495   : > { %v648_v8 = vrot.slane %v647_v5, 2 }
 0x496   : > { %v636_v20 = vrot.slane %v635_v16, 2 }
 0x497   : > { %v649_v15 = vadd.f32 %v648_v8, %v647_v5 }
 0x498   : > { %v637_v24 = vadd.f32 %v636_v20, %v635_v16 }
 0x499   : > { %v650_v17 = vrot.slane %v649_v15, 1 }
 0x49a   : > { %v638_v34 = vrot.slane %v637_v24, 1 }
 0x49b   : > { %v651_v18 = vadd.f32 %v650_v17, %v649_v15 }
 0x49c   : > { %v639_v26 = vadd.f32 %v638_v34, %v637_v24 }
 0x49d   : > { %v652_v21 = vmul.f32 0.00048828125, %v651_v18 }
 0x49e   : > { %v640_v28 = vmul.f32 0.00048828125, %v639_v26 }
 0x49f   : > { %v653_v33 = vmax.f32 %v652_v21, 1e-06 }
 0x4a1   : > { %807 = vrcp.f32 %v653_v33 }
 0x4a7   : > { %v808_v25 = vpop.eup %807 }
 0x4a8   : > { %v655_v9 = vmul.f32 %v808_v25, %v653_v33 }
 0x4aa   : > { %v656_v27 = vsub.f32 2.0, %v655_v9 }
 0x4ac   : > { %v657_v29 = vmul.f32 %v808_v25, %v656_v27 }
 0x4ae   : > { %v658_v30 = vmul.f32 %v657_v29, %v640_v28 }
 0x4b0   : > { %v659_v31 = vsub.f32 1.0, %v658_v30 }
 0x4b2   : > { %662 = vperm.xlu2 %800, %v659_v31  }
 0x50c   : > { %v663_v32 = vpop.permute.xlu2 %662 }
 0x50d   : > { %v665_v35 = vmul.f32 %v663_v32, %v627_v61  ;;  %v666_v36 = vmul.f32 %v663_v32, %v628_v62 }
 0x50f   : > { %v667_v37 = vadd.f32 %v665_v35, %v938_v47  ;;  %v668_v11 = vadd.f32 %v666_v36, %v938_v47 }
 0x511   : > { %v669_v38 = vmul.f32 -0.25, %v667_v37  ;;  %v670_v22 = vmul.f32 -0.25, %v668_v11 }
 0x513   : > { %v671_v39 = vadd.f32 %v669_v38, %v1029_v6  ;;  %v672_v12 = vadd.f32 %v670_v22, %v1032_v7 }
 0x515   : > { %673 = vst [vmem:[%s234_s7] sm:$0xff] %v671_v39 }
 0x516   : > { %674 = vst [vmem:[%s234_s7 + $0x8] sm:$0xff] %v672_v12 }
 0x517 PF: > { %s14_s15 = sadd.s32 1, %s815_s15  }
 0x518   : > { %p11_p4 = scmp.ge.s32.totalorder %s14_s15, 4  }
 0x51a   :  { %13 = sbr.rel (!%p11_p4) target bundleno = 1 (0x1), region = 75 }

</bundles_post_ra>
